<compile_context>
chip_gen: v7x
topology: tpu7x:2x2x1
jax: 0.10.0
libtpu: 0.0.40
codegen_flags: <defaults>
</compile_context>

<pallas_src>
import math

import jax
import jax.numpy as jnp
from jax.experimental import pallas as pl
from jax.experimental.pallas import tpu as pltpu


def _attn_kernel(x_ref, w_ref, b_ref, o_ref):
    TB, N, D = x_ref.shape
    x = x_ref[...].astype(jnp.float32)            # (TB, N, D)
    w = w_ref[...].astype(jnp.float32)            # (D, 3D)  pre-transposed, q-scaled
    b = b_ref[...].astype(jnp.float32)            # (1, 3D)

    # Fused Q/K/V projection: one (TB*N, D) x (D, 3D) MXU matmul.
    x2 = x.reshape(TB * N, D)                     # sublane-only reshape (last dim unchanged)
    qkv = jnp.dot(x2, w, preferred_element_type=jnp.float32) + b   # (TB*N, 3D)

    q = qkv[:, 0 * D:1 * D].reshape(TB, N, D)     # already scaled by 1/sqrt(D)
    k = qkv[:, 1 * D:2 * D].reshape(TB, N, D)
    v = qkv[:, 2 * D:3 * D].reshape(TB, N, D)

    # Batched scaled-dot-product attention over the TB slabs.
    scores = jnp.einsum("bnd,bmd->bnm", q, k,
                        preferred_element_type=jnp.float32)        # (TB, N, N)

    # Numerically stable softmax along the last axis (f32 throughout).
    m = jnp.max(scores, axis=-1, keepdims=True)
    e = jnp.exp(scores - m)
    s = jnp.sum(e, axis=-1, keepdims=True)
    probs = e * pl.reciprocal(s, approx=True)     # EUP reciprocal instead of VALU divide

    out = jnp.einsum("bnm,bmd->bnd", probs, v,
                     preferred_element_type=jnp.float32)           # (TB, N, D)
    o_ref[...] = out.astype(o_ref.dtype)


def self_attention_for_projection(particles, wq, bq, wk, bk, wv, bv):
    """particles: (B, S, N, D); w*: (D, D) torch-Linear (out, in); b*: (D,)."""
    B, S, N, D = particles.shape
    BS = B * S
    x = particles.reshape(BS, N, D)

    # torch.nn.Linear: y = x @ W^T + b.  Pre-transpose to (in, out) and fuse
    # q/k/v into one weight; fold the 1/sqrt(D) attention scale into the query
    # projection so the kernel never rescales the (N, N) scores.
    inv_sqrt_d = 1.0 / math.sqrt(D)
    w_qkv = jnp.concatenate(
        [wq.T * inv_sqrt_d, wk.T, wv.T], axis=1).astype(particles.dtype)      # (D, 3D)
    b_qkv = jnp.concatenate(
        [bq * inv_sqrt_d, bk, bv], axis=0).reshape(1, 3 * D).astype(particles.dtype)

    # Collapse the grid: at least 2 parallel steps (when divisible) so both
    # v7x TensorCores have work; on v5e/v6e this just means 2 cheap steps.
    G = 2 if (BS >= 2 and BS % 2 == 0) else 1
    TB = BS // G

    out = pl.pallas_call(
        _attn_kernel,
        out_shape=jax.ShapeDtypeStruct((BS, N, D), particles.dtype),
        grid_spec=pltpu.PrefetchScalarGridSpec(
            num_scalar_prefetch=0,
            grid=(G,),
            in_specs=[
                pl.BlockSpec((TB, N, D), lambda i: (i, 0, 0)),   # x slab
                pl.BlockSpec((D, 3 * D), lambda i: (0, 0)),      # fused W_qkv
                pl.BlockSpec((1, 3 * D), lambda i: (0, 0)),      # fused b_qkv
            ],
            out_specs=pl.BlockSpec((TB, N, D), lambda i: (i, 0, 0)),
        ),
        compiler_params=pltpu.CompilerParams(
            dimension_semantics=("parallel",)),
    )(x, w_qkv, b_qkv)

    return out.reshape(B, S, N, D)


def _reference(particles, wq, bq, wk, bk, wv, bv):
    B, S, N, D = particles.shape
    x = particles.reshape(B * S, N, D)
    q = jnp.einsum("bnd,ed->bne", x, wq) + bq
    k = jnp.einsum("bnd,ed->bne", x, wk) + bk
    v = jnp.einsum("bnd,ed->bne", x, wv) + bv
    scores = jnp.einsum("bne,bme->bnm", q, k) / math.sqrt(D)
    probs = jax.nn.softmax(scores, axis=-1)
    out = jnp.einsum("bnm,bmd->bnd", probs, v)
    return out.reshape(B, S, N, D)


if __name__ == "__main__":
    # Module-consistent small shapes: B=2, S=8 (seq), N=16 (particles), D=32.
    B, S, N, D = 2, 8, 16, 32
    key = jax.random.PRNGKey(0)
    kx, kwq, kbq, kwk, kbk, kwv, kbv = jax.random.split(key, 7)

    particles = jax.random.normal(kx, (B, S, N, D), dtype=jnp.float32)

    # Deterministic PyTorch-style Linear init: U(-1/sqrt(D), 1/sqrt(D)).
    bound = 1.0 / math.sqrt(D)
    wq = jax.random.uniform(kwq, (D, D), jnp.float32, -bound, bound)
    bq = jax.random.uniform(kbq, (D,), jnp.float32, -bound, bound)
    wk = jax.random.uniform(kwk, (D, D), jnp.float32, -bound, bound)
    bk = jax.random.uniform(kbk, (D,), jnp.float32, -bound, bound)
    wv = jax.random.uniform(kwv, (D, D), jnp.float32, -bound, bound)
    bv = jax.random.uniform(kbv, (D,), jnp.float32, -bound, bound)

    out = self_attention_for_projection(particles, wq, bq, wk, bk, wv, bv)
    out = jax.block_until_ready(out)

    ref = _reference(particles, wq, bq, wk, bk, wv, bv)
    assert out.shape == (B, S, N, D)
    # Slightly looser than 1e-4 purely because of the EUP approximate reciprocal
    # in the softmax; the matmul path is f32 end-to-end.
    assert jnp.allclose(out, ref, atol=2e-3, rtol=2e-3), "mismatch vs JAX reference"

    print("KERNEL_OK")
</pallas_src>

<mosaic_0001>
module attributes {stable_mosaic.version = 11 : i64} {
  func.func @_attn_kernel(%arg0: i32, %arg1: memref<8x16x32xf32, #tpu.memory_space<vmem>>, %arg2: memref<32x96xf32, #tpu.memory_space<vmem>>, %arg3: memref<1x96xf32, #tpu.memory_space<vmem>>, %arg4: memref<8x16x32xf32, #tpu.memory_space<vmem>>) attributes {dimension_semantics = [#tpu.dimension_semantics<parallel>], iteration_bounds = array<i64: 2>, scalar_prefetch = 0 : i64, scratch_operands = 0 : i64, tpu.core_type = #tpu.core_type<tc>, window_params = [{transform_indices = @transform_0, window_bounds = array<i64: 8, 16, 32>}, {pipeline_mode = #tpu.pipeline_mode<synchronous>, transform_indices = @transform_1, window_bounds = array<i64: 32, 96>}, {pipeline_mode = #tpu.pipeline_mode<synchronous>, transform_indices = @transform_2, window_bounds = array<i64: 1, 96>}, {transform_indices = @transform_3, window_bounds = array<i64: 8, 16, 32>}]} {
    %c0 = arith.constant 0 : index
    %c0_0 = arith.constant 0 : index
    %c0_1 = arith.constant 0 : index
    %0 = vector.load %arg1[%c0, %c0_0, %c0_1] : memref<8x16x32xf32, #tpu.memory_space<vmem>>, vector<8x16x32xf32>
    %c0_2 = arith.constant 0 : index
    %c0_3 = arith.constant 0 : index
    %1 = vector.load %arg2[%c0_2, %c0_3] : memref<32x96xf32, #tpu.memory_space<vmem>>, vector<32x96xf32>
    %c0_4 = arith.constant 0 : index
    %c0_5 = arith.constant 0 : index
    %2 = vector.load %arg3[%c0_4, %c0_5] : memref<1x96xf32, #tpu.memory_space<vmem>>, vector<1x96xf32>
    %3 = vector.shape_cast %0 : vector<8x16x32xf32> to vector<128x32xf32>
    %cst = arith.constant dense<0.000000e+00> : vector<128x96xf32>
    %4 = tpu.matmul %3, %1, %cst {dimension_numbers = #tpu.dot_dimension_numbers<[1], [0], [0], [1], [0, 0, 1, 1], [], []>} : vector<128x32xf32>, vector<32x96xf32>, vector<128x96xf32> -> vector<128x96xf32>
    %5 = vector.broadcast %2 : vector<1x96xf32> to vector<128x96xf32>
    %6 = arith.addf %4, %5 : vector<128x96xf32>
    %7 = vector.extract_strided_slice %6 {offsets = [0, 0], sizes = [128, 32], strides = [1, 1]} : vector<128x96xf32> to vector<128x32xf32>
    %8 = vector.shape_cast %7 : vector<128x32xf32> to vector<8x16x32xf32>
    %9 = vector.extract_strided_slice %6 {offsets = [0, 32], sizes = [128, 32], strides = [1, 1]} : vector<128x96xf32> to vector<128x32xf32>
    %10 = vector.shape_cast %9 : vector<128x32xf32> to vector<8x16x32xf32>
    %11 = vector.extract_strided_slice %6 {offsets = [0, 64], sizes = [128, 32], strides = [1, 1]} : vector<128x96xf32> to vector<128x32xf32>
    %12 = vector.shape_cast %11 : vector<128x32xf32> to vector<8x16x32xf32>
    "tpu.trace_start"() <{level = 10 : i32, message = "bnd,bmd->bnm"}> : () -> ()
    %cst_6 = arith.constant dense<0.000000e+00> : vector<8x16x16xf32>
    %13 = tpu.matmul %8, %10, %cst_6 {dimension_numbers = #tpu.dot_dimension_numbers<[2], [2], [1], [1], [0, 0, 0, 1, 1, 1], [0], [0]>} : vector<8x16x32xf32>, vector<8x16x32xf32>, vector<8x16x16xf32> -> vector<8x16x16xf32>
    "tpu.trace_stop"() : () -> ()
    %cst_7 = arith.constant dense<0xFF800000> : vector<8x16xf32>
    %14 = vector.multi_reduction <maximumf>, %13, %cst_7 [2] : vector<8x16x16xf32> to vector<8x16xf32>
    %15 = vector.shape_cast %14 : vector<8x16xf32> to vector<8x16x1xf32>
    %16 = vector.broadcast %15 : vector<8x16x1xf32> to vector<8x16x16xf32>
    %17 = arith.subf %13, %16 : vector<8x16x16xf32>
    %18 = math.exp %17 : vector<8x16x16xf32>
    %cst_8 = arith.constant dense<0.000000e+00> : vector<8x16xf32>
    %19 = vector.multi_reduction <add>, %18, %cst_8 [2] : vector<8x16x16xf32> to vector<8x16xf32>
    %20 = vector.shape_cast %19 : vector<8x16xf32> to vector<8x16x1xf32>
    %21 = tpu.reciprocal %20 {approx = true} : vector<8x16x1xf32> -> vector<8x16x1xf32>
    %22 = vector.broadcast %21 : vector<8x16x1xf32> to vector<8x16x16xf32>
    %23 = arith.mulf %18, %22 : vector<8x16x16xf32>
    "tpu.trace_start"() <{level = 10 : i32, message = "bnm,bmd->bnd"}> : () -> ()
    %cst_9 = arith.constant dense<0.000000e+00> : vector<8x16x32xf32>
    %24 = tpu.matmul %23, %12, %cst_9 {dimension_numbers = #tpu.dot_dimension_numbers<[2], [1], [1], [2], [0, 0, 0, 1, 1, 2], [0], [0]>} : vector<8x16x16xf32>, vector<8x16x32xf32>, vector<8x16x32xf32> -> vector<8x16x32xf32>
    "tpu.trace_stop"() : () -> ()
    %c0_10 = arith.constant 0 : index
    %c0_11 = arith.constant 0 : index
    %c0_12 = arith.constant 0 : index
    %25 = vector.load %arg4[%c0_10, %c0_11, %c0_12] : memref<8x16x32xf32, #tpu.memory_space<vmem>>, vector<8x16x32xf32>
    tpu.vector_store %arg4[%c0_10, %c0_11, %c0_12], %24 {strides = array<i32>} : memref<8x16x32xf32, #tpu.memory_space<vmem>>, vector<8x16x32xf32>,
    return
  }
  func.func @transform_0(%arg0: i32) -> (i32, i32, i32) {
    %c0_i32 = arith.constant 0 : i32
    %c0_i32_0 = arith.constant 0 : i32
    %c0_i32_1 = arith.constant 0 : i32
    return %arg0, %c0_i32, %c0_i32_0 : i32, i32, i32
  }
  func.func @transform_1(%arg0: i32) -> (i32, i32) {
    %c0_i32 = arith.constant 0 : i32
    %c0_i32_0 = arith.constant 0 : i32
    %c0_i32_1 = arith.constant 0 : i32
    return %c0_i32, %c0_i32_0 : i32, i32
  }
  func.func @transform_2(%arg0: i32) -> (i32, i32) {
    %c0_i32 = arith.constant 0 : i32
    %c0_i32_0 = arith.constant 0 : i32
    %c0_i32_1 = arith.constant 0 : i32
    return %c0_i32, %c0_i32_0 : i32, i32
  }
  func.func @transform_3(%arg0: i32) -> (i32, i32, i32) {
    %c0_i32 = arith.constant 0 : i32
    %c0_i32_0 = arith.constant 0 : i32
    %c0_i32_1 = arith.constant 0 : i32
    return %arg0, %c0_i32, %c0_i32_0 : i32, i32, i32
  }
}

</mosaic_0001>

<bundles_post_ra>
// kernel: tpu_custom_call.1
= control target key start
LH: loop header
LB: loop body
LE: loop exit
PB: predicated region body
PF: predicated region fallthrough
CT: control target
= control target key end

     0   :  { %8 = vsyncpa [#allocation3], 0  ;;  %s3485_s0 = inlined_call_operand.hbm [shape: f32[16,16,32], index: 0, kind: input, shape index: {}]   ;;  %s3486_s1 = inlined_call_operand.hbm [shape: f32[32,96], index: 1, kind: input, shape index: {}]   ;;  %s3487_s2 = inlined_call_operand.vmem [shape: f32[1,96], index: 2, kind: input, shape index: {}]   ;;  %s3488_s3 = inlined_call_operand.hbm [shape: f32[16,16,32], index: 3, kind: output, shape index: {}]  }
   0x1   :  { %10 = vsyncpa [#allocation3 + $0x1], 0 }
   0x2   :  { %11 = vsyncpa [#allocation6], 0 }
   0x3   :  { %12 = vsyncpa [#allocation4], 0 }
   0x4   :  { %14 = vsyncpa [#allocation4 + $0x1], 0  ;;  %s2896_s12 = smov 0   ;;  %s2898_s13 = smov 0  }
   0x5   :  { %s2900_s14 = smov 0   ;;  %s2902_s15 = smov 0  }
   0x6 LB: > { %s2917_s16 = sadd.s32 4294967295, %s2865_s15   ;;  %s2127_s17 = sadd.s32 4294967294, %s2865_s15   ;;  %s2865_s15 = sphi %s2902_s15, %s3510_s15   ;;  %s2861_s14 = sphi %s2900_s14, %s3509_s14   ;;  %s2857_s13 = sphi %s2898_s13, %s3508_s13   ;;  %s2853_s12 = sphi %s2896_s12, %s3507_s12  }
   0x7   : > { %p40_p0 = scmp.ne.s32.totalorder %s2857_s13, %s2853_s12  ;;  %p3489_p1 = scmp.eq.s32.totalorder %s2917_s16, 0 }
   0x8   : > { %p112_p3 = scmp.eq.s32.totalorder %s2127_s17, 1  ;;  %p2128_p5 = scmp.ge.s32.totalorder %s2865_s15, 1 }
   0x9   : > { %p2926_p4 = por %p3489_p1, %p40_p0  ;;  %p119_p7 = scmp.lt.s32.totalorder %s2865_s15, 3 }
   0xa   : > { %p2931_p6 = por %p112_p3, %p40_p0  ;;  %s2867_s21 = smov [#allocation5]  }
   0xb   : > { %s3492_s18 = scalar_select %p2926_p4, 1, 0 }
   0xc   : > { %s3493_s19 = scalar_select %p2931_p6, 1, 0 }
   0xd   : > { %p2936_p8 = pnand %p2128_p5, %p119_p7  ;;  %s131_s22 = sshll.u32 %s2867_s21, 4  ;;  %s2940_s22 = int_to_ptr.vmem [resolvable:$true] %s131_s22 }
   0xe   : > { %s2952_s24 = sadd.s32 1, %s2865_s15   ;;  %s27_s25 = sadd.s32 1, %s2861_s14 }
   0xf   : > { %s3494_s20 = scalar_select %p2936_p8, 1, 0 }
  0x10   : > { %p2538_p9 = pneg %p2936_p8  ;;  %s24_s26 = ssub.s32 %s2865_s15, %s2952_s24 }
  0x11   : > { %s2737_s29 = scalar_lea.hbm %s3486_s1, 512 }
  0x12   : > { %p2947_p11 = pnand %p2538_p9, %p3489_p1  ;;  %p2738_p12 = scmp.ne.s32.totalorder %s3486_s1, %s2737_s29 }
  0x13   : > { %p2744_p5 = scmp.lt.u32.totalorder %s2737_s29, %s3486_s1 }
  0x14   : > { %p2739_p13 = pneg %p2947_p11 }
  0x16   : > { %p2740_p0 = pnand %p2739_p13, %p2738_p12 }
  0x18   : > { %p2741_p3 = pneg %p2740_p0 }
  0x1a   : > { %p2746_p7 = pnand %p2744_p5, %p2741_p3 }
  0x1c   : > { %2749 = shalt.err (!%p2746_p7)
}
  0x1d   : > { %s2750_s7 = scalar_lea.vmem %s2940_s22, 512  ;;  %p2758_p2 = scmp.lt.s32.totalorder %s2940_s22, %s2940_s22 }
  0x1e   : > { %p2751_p9 = scmp.ne.s32.totalorder %s2940_s22, %s2750_s7  ;;  %p2759_p6 = scmp.lt.s32.totalorder %s2750_s7, %s2750_s7 }
  0x20   : > { %p2753_p10 = pnand %p2751_p9, %p2739_p13  ;;  %p2760_p4 = por %p2759_p6, %p2758_p2 }
  0x22   : > { %p2754_p1 = pneg %p2753_p10 }
  0x24   : > { %p2761_p8 = pnand %p2760_p4, %p2754_p1 }
  0x26   : > { %2764 = shalt.err (!%p2761_p8)
}
  0x27   : > { %s2868_s8 = smov 128   ;;  %s2869_s9 = smov 8  }
  0x28   : > { %2541 = dma.hbm_to_vmem [thread:$0]  (!%p2947_p11), %s3486_s1, 512, %s2940_s22, [#allocation6], %s2868_s8, %s2868_s8, %s2869_s9  }
  0x29   : > { %p25_p1 = scmp.eq.s32.totalorder %s24_s26, 0  ;;  %p34_p2 = scmp.ne.s32.totalorder %s2861_s14, %s2857_s13 }
  0x2a   : > { %p35_p4 = scmp.eq.s32.totalorder %s2865_s15, 0  ;;  %p2551_p6 = scmp.lt.s32.totalorder %s2865_s15, 2 }
  0x2b   : > { %s2986_s17 = scalar_select %p25_p1, %s2861_s14, %s27_s25  }
  0x2c   : > { %p36_p8 = por %p35_p4, %p34_p2  ;;  %p3496_p10 = scmp.eq.s32.totalorder %s2917_s16, 1 }
  0x2d   : > { %s148_s23 = sand.u32 1, %s2861_s14   ;;  %s2211_s27 = sshll.u32 %s2865_s15, 11 }
  0x2e   : > { %p2990_p12 = por %p3496_p10, %p34_p2  ;;  %s2131_s28 = sshll.u32 %s148_s23, 7 }
  0x2f   : > { %s2999_s4 = scalar_lea.hbm %s3485_s0, %s2211_s27  ;;  %s152_s22 = scalar_lea.vmem [#allocation2], %s2131_s28 }
  0x30   : > { %s160_s25 = sshll.u32 %s152_s22, 4  ;;  %p3001_p11 = pnand %p2551_p6, %p36_p8  ;;  %s3005_s25 = int_to_ptr.vmem [resolvable:$true] %s160_s25 }
  0x31   : > { %s3007_s5 = scalar_lea.sflag [#allocation3], %s148_s23  ;;  %s2765_s6 = scalar_lea.hbm %s2999_s4, 2048 }
  0x32   : > { %p2766_p13 = scmp.ne.s32.totalorder %s2999_s4, %s2765_s6  ;;  %p2767_p0 = pneg %p3001_p11 }
  0x33   : > { %s2770_s11 = scalar_lea.hbm %s3485_s0, 4096  ;;  %p2771_p7 = scmp.lt.u32.totalorder %s2999_s4, %s3485_s0 }
  0x34   : > { %p2768_p3 = pnand %p2767_p0, %p2766_p13  ;;  %p2772_p9 = scmp.lt.u32.totalorder %s2770_s11, %s2765_s6 }
  0x35   : > { %p2774_p2 = scmp.lt.u32.totalorder %s2765_s6, %s2999_s4 }
  0x36   : > { %p2769_p5 = pneg %p2768_p3  ;;  %p2773_p1 = por %p2772_p9, %p2771_p7 }
  0x38   : > { %p2775_p4 = por %p2774_p2, %p2773_p1 }
  0x3a   : > { %p2776_p6 = pnand %p2775_p4, %p2769_p5 }
  0x3c   : > { %2779 = shalt.err (!%p2776_p6)
}
  0x3d   : > { %s2780_s23 = scalar_lea.vmem %s3005_s25, 2048  ;;  %s2870_s29 = smov [#allocation2]  }
  0x3e   : > { %p2781_p8 = scmp.ne.s32.totalorder %s3005_s25, %s2780_s23  ;;  %s2785_s30 = sshll.u32 %s2870_s29, 4  ;;  %s2786_s30 = int_to_ptr.vmem [resolvable:$false] %s2785_s30 }
  0x3f   : > { %s2787_s22 = scalar_lea.vmem %s2786_s30, 4096  ;;  %p2788_p3 = scmp.lt.s32.totalorder %s3005_s25, %s2786_s30 }
  0x40   : > { %p2783_p10 = pnand %p2781_p8, %p2767_p0  ;;  %p2789_p7 = scmp.lt.s32.totalorder %s2787_s22, %s2780_s23 }
  0x42   : > { %p2784_p13 = pneg %p2783_p10  ;;  %p2790_p9 = por %p2789_p7, %p2788_p3 }
  0x44   : > { %p2791_p1 = pnand %p2790_p9, %p2784_p13 }
  0x46   : > { %2794 = shalt.err (!%p2791_p1)
}
  0x47   : > { %2545 = dma.hbm_to_vmem [thread:$0]  (!%p3001_p11), %s2999_s4, 2048, %s3005_s25, %s3007_s5, %s2868_s8, %s2868_s8, %s2869_s9  }
  0x48   : > { %p3499_p0 = scmp.ne.s32.totalorder %s3494_s20, 0 }
  0x49   : > { %s3041_s6 = sand.u32 (!%p3499_p0), 1, %s2857_s13   ;;  %p3500_p5 = scmp.ne.s32.totalorder (!%p3499_p0), %s3492_s18, 0 }
  0x4a   : > { %172 = sbr.rel (%p3499_p0) target bundleno = 1240 (0x4d8), region = 32  ;;  %s2136_s7 = sshll.u32 (!%p3499_p0), %s3041_s6, 7 }
  0x4b   : > { %s175_s10 = scalar_lea.sflag (!%p3499_p0), [#allocation3], %s3041_s6  ;;  %s3047_s26 = scalar_lea.vmem (!%p3499_p0), [#allocation2], %s2136_s7 }
  0x51   : > { %2840 = dma.done.wait (%p3500_p5), %s175_s10, 2048  }
  0x52   : > { %2842 = vsyncadd (%p3500_p5), %s175_s10, 4294965248  ;;  %p3501_p11 = scmp.eq.s32.totalorder %s2917_s16, 0 }
  0x54   : > { %2844 = dma.done.wait (%p3501_p11), [#allocation6], 512   ;;  %p3502_p2 = pmov %p3501_p11 }
  0x55   : > { %vm234_vm0 = vcmask 261120   ;;  %v223_v0 = vld [vmem:[#allocation5] sm:$0xff]  ;;  %v224_v1 = vld [vmem:[#allocation5 + $0x8] sm:$0xff]  ;;  %v225_v2 = vld [vmem:[#allocation5 + $0x10] sm:$0xff]  ;;  %s2871_s8 = smov 96   ;;  %s2872_s9 = smov 64  }
  0x56   : > { %2846 = vsyncadd (%p3502_p2), [#allocation6], 4294966784  ;;  %v2442_v3 = vpack.c.bf16 %v224_v1, %v223_v0  ;;  %v226_v4 = vld [vmem:[#allocation5 + $0x18] sm:$0xff]  ;;  %v207_v5 = vld [vmem:[%s3047_s26] sm:$0xff]  ;;  %vm1140_vm2 = vcmask 130048   ;;  %s3400_s4 = scalar_lea.vmem [#allocation7], %s2136_s7 }
  0x57   : > { %v2446_v6 = vpack.c.bf16 %v226_v4, %v225_v2  ;;  %2306 = vmatprep.mubr.msk.f32.mxu0 %vm234_vm0, %v207_v5  ;;  %v208_v7 = vld [vmem:[%s3047_s26 + $0x8] sm:$0xff]  ;;  %v209_v8 = vld [vmem:[%s3047_s26 + $0x10] sm:$0xff]  ;;  %v210_v9 = vld [vmem:[%s3047_s26 + $0x18] sm:$0xff]  ;;  %s2213_s25 = sshll.u32 %s2917_s16, 11  ;;  %s2044_s5 = sshll.u32 %s3400_s4, 4  ;;  %s3435_s5 = int_to_ptr.vmem [resolvable:$true] %s2044_s5 }
  0x58   : > { %2443 = vmatprep.subr.bf16.mxu0 %v2442_v3  ;;  %v211_v10 = vld [vmem:[%s3047_s26 + $0x20] sm:$0xff]  ;;  %v212_v11 = vld [vmem:[%s3047_s26 + $0x28] sm:$0xff]  ;;  %v213_v12 = vld [vmem:[%s3047_s26 + $0x30] sm:$0xff]  ;;  %s3433_s28 = scalar_lea.hbm %s3488_s3, %s2213_s25  ;;  %s2030_s16 = scalar_lea.sflag [#allocation4], %s3041_s6 }
  0x59   : > { %2445 = vmatpush3.bf16.msra.mxu0 %v2442_v3  ;;  %v214_v13 = vld [vmem:[%s3047_s26 + $0x38] sm:$0xff]  ;;  %v215_v14 = vld [vmem:[%s3047_s26 + $0x40] sm:$0xff]  ;;  %v216_v15 = vld [vmem:[%s3047_s26 + $0x48] sm:$0xff]  ;;  %s2795_s23 = scalar_lea.vmem %s3435_s5, 2048  ;;  %s2873_s29 = smov [#allocation7]  }
  0x5a   : > { %2447 = vmatprep.subr.bf16.mxu0 %v2446_v6  ;;  %v217_v16 = vld [vmem:[%s3047_s26 + $0x50] sm:$0xff]  ;;  %v218_v17 = vld [vmem:[%s3047_s26 + $0x58] sm:$0xff]  ;;  %v219_v18 = vld [vmem:[%s3047_s26 + $0x60] sm:$0xff]  ;;  %p2796_p4 = scmp.ne.s32.totalorder %s3435_s5, %s2795_s23  ;;  %s2799_s30 = sshll.u32 %s2873_s29, 4  ;;  %s2800_s30 = int_to_ptr.vmem [resolvable:$false] %s2799_s30 }
  0x5b   : > { %v220_v19 = vld [vmem:[%s3047_s26 + $0x68] sm:$0xff]  ;;  %v221_v20 = vld [vmem:[%s3047_s26 + $0x70] sm:$0xff]  ;;  %v222_v21 = vld [vmem:[%s3047_s26 + $0x78] sm:$0xff]  ;;  %s2801_s22 = scalar_lea.vmem %s2800_s30, 4096  ;;  %p2802_p10 = scmp.lt.s32.totalorder %s3435_s5, %s2800_s30 }
  0x5c   : > { %v2139_v22 = vld [vmem:[%s3487_s2] ss:$0 sm:$0xff]  ;;  %vm3162_vm1 = vmpackc.low %vm234_vm0, %vm234_vm0  ;;  %p2797_p6 = pnand %p2796_p4, %p2990_p12  ;;  %p2803_p13 = scmp.lt.s32.totalorder %s2801_s22, %s2795_s23 }
  0x5d   : > { %2449 = vmatpush3.bf16.msra.mxu0 %v2446_v6 }
  0x5e   : > { %p2798_p8 = pneg %p2797_p6  ;;  %p2804_p3 = por %p2803_p13, %p2802_p10 }
  0x60   : > { %2307 = vmatmul.mubr.msk.f32.vlgmr.msra.gmra.mrb[0].mxu0 %vm234_vm0, %v208_v7  ;;  %p2805_p7 = pnand %p2804_p3, %p2798_p8 }
  0x61   : > { %2309 = vmatprep.mubr.msk.f32.mxu0 %vm234_vm0, %v209_v8 }
  0x64   : > { %2310 = vmatmul.mubr.msk.f32.gmra.mrb[2].mxu0 %vm234_vm0, %v210_v9 }
  0x65   : > { %2312 = vmatprep.mubr.msk.f32.mxu0 %vm234_vm0, %v211_v10 }
  0x68   : > { %2313 = vmatmul.mubr.msk.f32.gmra.mrb[4].mxu0 %vm234_vm0, %v212_v11 }
  0x69   : > { %2315 = vmatprep.mubr.msk.f32.mxu0 %vm234_vm0, %v213_v12 }
  0x6c   : > { %2316 = vmatmul.mubr.msk.f32.gmra.mrb[6].mxu0 %vm234_vm0, %v214_v13 }
  0x6d   : > { %2318 = vmatprep.mubr.msk.f32.mxu0 %vm234_vm0, %v215_v14 }
  0x70   : > { %2319 = vmatmul.mubr.msk.f32.gmra.mrb[8].mxu0 %vm234_vm0, %v216_v15 }
  0x71   : > { %2321 = vmatprep.mubr.msk.f32.mxu0 %vm234_vm0, %v217_v16 }
  0x74   : > { %2322 = vmatmul.mubr.msk.f32.gmra.mrb[10].mxu0 %vm234_vm0, %v218_v17 }
  0x75   : > { %2324 = vmatprep.mubr.msk.f32.mxu0 %vm234_vm0, %v219_v18 }
  0x78   : > { %2325 = vmatmul.mubr.msk.f32.gmra.mrb[12].mxu0 %vm234_vm0, %v220_v19 }
  0x79   : > { %2327 = vmatprep.mubr.msk.f32.mxu0 %vm234_vm0, %v221_v20 }
  0x7c   : > { %2328 = vmatmul.mubr.msk.f32.gmra.mrb[14].mxu0 %vm234_vm0, %v222_v21 }
 0x133   : > { %v2308_v23 = vpop.f32.mrb[0].mxu0 }
 0x134   : > { %v3092_v24 = vadd.f32 %v2308_v23, %v2139_v22  ;;  %v349_v25 = vpop.f32.mrb[1].mxu0 }
 0x135   : > { %v350_v26 = vadd.f32 %v2139_v22, %v349_v25 }
 0x137   : > { %v2311_v27 = vpop.f32.mrb[2].mxu0  ;;  %2334 = vmatprep.mubr.msk.f32.mxu1 %vm234_vm0, %v350_v26  ;;  %v2593_v28 = vpack.i.bf16 %v3092_v24, %v350_v26 }
 0x138   : > { %v3096_v29 = vadd.f32 %v2311_v27, %v2139_v22  ;;  %v359_v30 = vpop.f32.mrb[3].mxu0 }
 0x139   : > { %v3098_v31 = vadd.f32 %v2139_v22, %v359_v30  ;;  %2594 = vrot.lane.b32.xlu0 %v2593_v28, %s2871_s8 }
 0x13b   : > { %v2314_v32 = vpop.f32.mrb[4].mxu0  ;;  %v2598_v33 = vpack.i.bf16 %v3096_v29, %v3098_v31 }
 0x13c   : > { %v3103_v34 = vadd.f32 %v2314_v32, %v2139_v22  ;;  %v369_v35 = vpop.f32.mrb[5].mxu0 }
 0x13d   : > { %v3105_v36 = vadd.f32 %v2139_v22, %v369_v35  ;;  %2599 = vrot.lane.b32.xlu0 %v2598_v33, %s2871_s8 }
 0x13f   : > { %v2317_v37 = vpop.f32.mrb[6].mxu0  ;;  %v2603_v38 = vpack.i.bf16 %v3103_v34, %v3105_v36 }
 0x140   : > { %v3110_v39 = vadd.f32 %v2317_v37, %v2139_v22  ;;  %v379_v40 = vpop.f32.mrb[7].mxu0 }
 0x141   : > { %v3112_v41 = vadd.f32 %v2139_v22, %v379_v40  ;;  %2604 = vrot.lane.b32.xlu1 %v2603_v38, %s2871_s8 }
 0x143   : > { %v2320_v42 = vpop.f32.mrb[8].mxu0  ;;  %v2608_v43 = vpack.i.bf16 %v3110_v39, %v3112_v41 }
 0x144   : > { %v3117_v44 = vadd.f32 %v2320_v42, %v2139_v22  ;;  %v389_v45 = vpop.f32.mrb[9].mxu0 }
 0x145   : > { %v390_v46 = vadd.f32 %v2139_v22, %v389_v45  ;;  %2609 = vrot.lane.b32.xlu1 %v2608_v43, %s2871_s8 }
 0x147   : > { %2362 = vmatprep.mubr.msk.f32.mxu0 %vm234_vm0, %v390_v46  ;;  %v2323_v47 = vpop.f32.mrb[10].mxu0  ;;  %v3122_v48 = vpack.i.bf16 %v3117_v44, %v390_v46 }
 0x148   : > { %v3124_v49 = vadd.f32 %v2323_v47, %v2139_v22  ;;  %v399_v50 = vpop.f32.mrb[11].mxu0 }
 0x149   : > { %2614 = vrot.lane.b32.xlu0 %v3122_v48, %s2871_s8  ;;  %v3128_v51 = vadd.f32 %v2139_v22, %v399_v50 }
 0x14b   : > { %v2326_v52 = vpop.f32.mrb[12].mxu0  ;;  %v3132_v53 = vpack.i.bf16 %v3124_v49, %v3128_v51 }
 0x14c   : > { %v3134_v54 = vadd.f32 %v2326_v52, %v2139_v22  ;;  %v409_v55 = vpop.f32.mrb[13].mxu0 }
 0x14d   : > { %v3136_v56 = vadd.f32 %v2139_v22, %v409_v55  ;;  %2619 = vrot.lane.b32.xlu1 %v3132_v53, %s2871_s8 }
 0x14f   : > { %v2329_v57 = vpop.f32.mrb[14].mxu0  ;;  %v3142_v58 = vpack.i.bf16 %v3134_v54, %v3136_v56 }
 0x150   : > { %v3144_v59 = vadd.f32 %v2329_v57, %v2139_v22  ;;  %v419_v60 = vpop.f32.mrb[15].mxu0 }
 0x151   : > { %v3146_v61 = vadd.f32 %v2139_v22, %v419_v60  ;;  %2624 = vrot.lane.b32.xlu0 %v3142_v58, %s2871_s8 }
 0x153   : > { %v3152_v62 = vpack.i.bf16 %v3144_v59, %v3146_v61 }
 0x155   : > { %2629 = vrot.lane.b32.xlu1 %v3152_v62, %s2871_s8  ;;  %2639 = vrot.lane.b32.xlu0 %v2598_v33, %s2872_s9 }
 0x159   : > { %2634 = vrot.lane.b32.xlu1 %v2593_v28, %s2872_s9 }
 0x15d   : > { %2644 = vrot.lane.b32.xlu1 %v2603_v38, %s2872_s9 }
 0x161   : > { %2649 = vrot.lane.b32.xlu1 %v2608_v43, %s2872_s9 }
 0x1ab   : > { %v2595_v63 = vpop.permute.xlu0 %2594 }
 0x1ac   : > { %v2597_v0 = vunpack.i.h.bf16 %v2595_v63  ;;  %v2596_v1 = vunpack.i.l.bf16 %v2595_v63 }
 0x1ae   : > { %v2450_v3 = vpack.c.bf16 %v2597_v0, %v2596_v1 }
 0x1af   : > { %v2600_v4 = vpop.permute.xlu0 %2599 }
 0x1b0   : > { %v2602_v5 = vunpack.i.h.bf16 %v2600_v4  ;;  %v2601_v6 = vunpack.i.l.bf16 %v2600_v4  ;;  %2452 = vmatprep.subr.msk.bf16.mxu1 %vm3162_vm1, %v2450_v3 }
 0x1b1   : > { %2455 = vmatpush3.bf16.xpose.msk.msra.mxu1 %vm3162_vm1, %v2450_v3 }
 0x1b2   : > { %v2456_v7 = vpack.c.bf16 %v2602_v5, %v2601_v6 }
 0x1b3   : > { %v2605_v8 = vpop.permute.xlu1 %2604 }
 0x1b4   : > { %v2607_v9 = vunpack.i.h.bf16 %v2605_v8  ;;  %v2606_v10 = vunpack.i.l.bf16 %v2605_v8  ;;  %2458 = vmatprep.subr.msk.bf16.mxu1 %vm3162_vm1, %v2456_v7 }
 0x1b6   : > { %v2462_v11 = vpack.c.bf16 %v2607_v9, %v2606_v10 }
 0x1b7   : > { %v2610_v12 = vpop.permute.xlu1 %2609 }
 0x1b8   : > { %2335 = vmatmul.mubr.msk.f32.vlgmr.msra.gmra.mrb[0].mxu1 %vm234_vm0, %v3092_v24  ;;  %v2612_v13 = vunpack.i.h.bf16 %v2610_v12  ;;  %v2611_v14 = vunpack.i.l.bf16 %v2610_v12 }
 0x1b9   : > { %2461 = vmatpush3.bf16.xpose.msk.msra.mxu1 %vm3162_vm1, %v2456_v7  ;;  %2341 = vmatprep.mubr.msk.f32.mxu1 %vm234_vm0, %v3098_v31 }
 0x1ba   : > { %2464 = vmatprep.subr.msk.bf16.mxu1 %vm3162_vm1, %v2462_v11  ;;  %v2468_v18 = vpack.c.bf16 %v2612_v13, %v2611_v14 }
 0x1bb   : > { %v2615_v15 = vpop.permute.xlu0 %2614 }
 0x1bc   : > { %v2617_v16 = vunpack.i.h.bf16 %v2615_v15  ;;  %v2616_v17 = vunpack.i.l.bf16 %v2615_v15 }
 0x1be   : > { %v2474_v19 = vpack.c.bf16 %v2617_v16, %v2616_v17 }
 0x1bf   : > { %v2620_v20 = vpop.permute.xlu1 %2619 }
 0x1c0   : > { %2342 = vmatmul.mubr.msk.f32.vlgmr.msra.gmra.mrb[2].mxu1 %vm234_vm0, %v3096_v29  ;;  %2476 = vmatprep.subr.msk.bf16.mxu0 %vm3162_vm1, %v2474_v19  ;;  %v2622_v21 = vunpack.i.h.bf16 %v2620_v20  ;;  %v2621_v22 = vunpack.i.l.bf16 %v2620_v20 }
 0x1c1   : > { %2467 = vmatpush3.bf16.xpose.msk.msra.mxu1 %vm3162_vm1, %v2462_v11  ;;  %2348 = vmatprep.mubr.msk.f32.mxu1 %vm234_vm0, %v3105_v36 }
 0x1c2   : > { %2479 = vmatpush3.bf16.xpose.msk.msra.mxu0 %vm3162_vm1, %v2474_v19  ;;  %2470 = vmatprep.subr.msk.bf16.mxu1 %vm3162_vm1, %v2468_v18  ;;  %v2480_v27 = vpack.c.bf16 %v2622_v21, %v2621_v22 }
 0x1c3   : > { %v2625_v23 = vpop.permute.xlu0 %2624 }
 0x1c4   : > { %v2627_v24 = vunpack.i.h.bf16 %v2625_v23  ;;  %v2626_v25 = vunpack.i.l.bf16 %v2625_v23 }
 0x1c6   : > { %v2486_v26 = vpack.c.bf16 %v2627_v24, %v2626_v25 }
 0x1c7   : > { %v2630_v28 = vpop.permute.xlu1 %2629  ;;  %v2640_v40 = vpop.permute.xlu0 %2639 }
 0x1c8   : > { %2349 = vmatmul.mubr.msk.f32.vlgmr.msra.gmra.mrb[4].mxu1 %vm234_vm0, %v3103_v34  ;;  %2488 = vmatprep.subr.msk.bf16.mxu0 %vm3162_vm1, %v2486_v26  ;;  %v2632_v29 = vunpack.i.h.bf16 %v2630_v28  ;;  %v2631_v30 = vunpack.i.l.bf16 %v2630_v28  ;;  %v2642_v42 = vunpack.i.h.bf16 %v2640_v40  ;;  %v2641_v43 = vunpack.i.l.bf16 %v2640_v40 }
 0x1c9   : > { %2363 = vmatmul.mubr.msk.f32.vlgmr.msra.gmra.mrb[16].mxu0 %vm234_vm0, %v3117_v44  ;;  %2473 = vmatpush3.bf16.xpose.msk.msra.mxu1 %vm3162_vm1, %v2468_v18 }
 0x1ca   : > { %2355 = vmatprep.mubr.msk.f32.mxu1 %vm234_vm0, %v3112_v41  ;;  %2491 = vmatpush3.bf16.xpose.msk.msra.mxu0 %vm3162_vm1, %v2486_v26  ;;  %v2492_v35 = vpack.c.bf16 %v2632_v29, %v2631_v30 }
 0x1cb   : > { %2376 = vmatprep.mubr.msk.f32.mxu0 %vm234_vm0, %v3136_v56  ;;  %v2635_v31 = vpop.permute.xlu1 %2634  ;;  %2482 = vmatprep.subr.msk.bf16.mxu1 %vm3162_vm1, %v2480_v27 }
 0x1cc   : > { %v2637_v32 = vunpack.i.h.bf16 %v2635_v31  ;;  %v2636_v33 = vunpack.i.l.bf16 %v2635_v31 }
 0x1ce   : > { %v2498_v34 = vpack.c.bf16 %v2637_v32, %v2636_v33 }
 0x1cf   : > { %v2645_v36 = vpop.permute.xlu1 %2644 }
 0x1d0   : > { %v2647_v37 = vunpack.i.h.bf16 %v2645_v36  ;;  %v2646_v38 = vunpack.i.l.bf16 %v2645_v36  ;;  %2356 = vmatmul.mubr.msk.f32.vlgmr.msra.gmra.mrb[6].mxu1 %vm234_vm0, %v3110_v39  ;;  %2499 = vmatprep.subr.bf16.mxu0 %v2498_v34  ;;  %v2502_v39 = vpack.c.bf16 %v2642_v42, %v2641_v43 }
 0x1d1   : > { %2377 = vmatmul.mubr.msk.f32.vlgmr.msra.gmra.mrb[18].mxu0 %vm234_vm0, %v3134_v54  ;;  %2485 = vmatpush3.bf16.xpose.msk.msra.mxu1 %vm3162_vm1, %v2480_v27 }
 0x1d2   : > { %v3214_v41 = vpack.c.bf16 %v2647_v37, %v2646_v38  ;;  %2369 = vmatprep.mubr.msk.f32.mxu1 %vm234_vm0, %v3128_v51  ;;  %2501 = vmatpush3.bf16.msra.mxu0 %v2498_v34 }
 0x1d3   : > { %2494 = vmatprep.subr.msk.bf16.mxu1 %vm3162_vm1, %v2492_v35  ;;  %v2650_v44 = vpop.permute.xlu1 %2649 }
 0x1d4   : > { %2507 = vmatprep.subr.bf16.mxu0 %v3214_v41  ;;  %v2652_v45 = vunpack.i.h.bf16 %v2650_v44  ;;  %v2651_v46 = vunpack.i.l.bf16 %v2650_v44 }
 0x1d6   : > { %v3227_v47 = vpack.c.bf16 %v2652_v45, %v2651_v46 }
 0x1d8   : > { %2370 = vmatmul.mubr.msk.f32.vlgmr.msra.gmra.mrb[8].mxu1 %vm234_vm0, %v3124_v49 }
 0x1d9   : > { %2497 = vmatpush3.bf16.xpose.msk.msra.mxu1 %vm3162_vm1, %v2492_v35  ;;  %2383 = vmatprep.mubr.msk.f32.mxu1 %vm234_vm0, %v3146_v61 }
 0x1da   : > { %2503 = vmatprep.subr.bf16.mxu1 %v2502_v39 }
 0x1e0   : > { %2384 = vmatmul.mubr.msk.f32.vlgmr.msra.gmra.mrb[10].mxu1 %vm234_vm0, %v3144_v59 }
 0x1e1   : > { %2505 = vmatpush3.bf16.msra.mxu1 %v2502_v39 }
 0x1e2   : > { %2511 = vmatprep.subr.bf16.mxu1 %v3227_v47 }
 0x28b   : > { %v2336_v49 = vpop.f32.mrb[0].mxu1 }
 0x28c   : > { %v508_v50 = vpop.f32.mrb[1].mxu1  ;;  %v1144_v51 = vsel %vm1140_vm2, %v2336_v49, -inf }
 0x28d   : > { %1145 = vmax.xlane.f32.xlu0 %v1144_v51  ;;  %v1141_v52 = vsel %vm1140_vm2, %v508_v50, -inf }
 0x291   : > { %1142 = vmax.xlane.f32.xlu0 %v1141_v52 }
 0x293   : > { %v2343_v54 = vpop.f32.mrb[2].mxu1 }
 0x294   : > { %v597_v55 = vpop.f32.mrb[3].mxu1  ;;  %v1150_v56 = vsel %vm1140_vm2, %v2343_v54, -inf }
 0x295   : > { %1151 = vmax.xlane.f32.xlu0 %v1150_v56  ;;  %v1147_v57 = vsel %vm1140_vm2, %v597_v55, -inf }
 0x296   : > { %1148 = vmax.xlane.f32.xlu1 %v1147_v57 }
 0x29b   : > { %v2350_v59 = vpop.f32.mrb[4].mxu1 }
 0x29c   : > { %v3236_v60 = vpop.f32.mrb[16].mxu0  ;;  %v3238_v61 = vpop.f32.mrb[5].mxu1  ;;  %v1156_v63 = vsel %vm1140_vm2, %v2350_v59, -inf }
 0x29d   : > { %v3241_v0 = vpop.f32.mrb[17].mxu0  ;;  %1157 = vmax.xlane.f32.xlu1 %v1156_v63  ;;  %v1168_v1 = vsel %vm1140_vm2, %v3236_v60, -inf  ;;  %v1153_v5 = vsel %vm1140_vm2, %v3238_v61, -inf }
 0x29e   : > { %v1165_v8 = vsel %vm1140_vm2, %v3241_v0, -inf }
 0x2a1   : > { %1169 = vmax.xlane.f32.xlu1 %v1168_v1 }
 0x2a3   : > { %v3245_v2 = vpop.f32.mrb[6].mxu1 }
 0x2a4   : > { %v3247_v3 = vpop.f32.mrb[18].mxu0  ;;  %v3249_v4 = vpop.f32.mrb[7].mxu1  ;;  %v1162_v6 = vsel %vm1140_vm2, %v3245_v2, -inf }
 0x2a5   : > { %v3255_v7 = vpop.f32.mrb[19].mxu0  ;;  %1154 = vmax.xlane.f32.xlu1 %v1153_v5  ;;  %1163 = vmax.xlane.f32.xlu0 %v1162_v6  ;;  %v1159_v9 = vsel %vm1140_vm2, %v3249_v4, -inf  ;;  %v1180_v12 = vsel %vm1140_vm2, %v3247_v3, -inf }
 0x2a6   : > { %v1177_v14 = vsel %vm1140_vm2, %v3255_v7, -inf }
 0x2a9   : > { %1166 = vmax.xlane.f32.xlu1 %v1165_v8  ;;  %1160 = vmax.xlane.f32.xlu0 %v1159_v9 }
 0x2ab   : > { %v3261_v10 = vpop.f32.mrb[8].mxu1 }
 0x2ac   : > { %v3263_v11 = vpop.f32.mrb[9].mxu1  ;;  %v1174_v13 = vsel %vm1140_vm2, %v3261_v10, -inf }
 0x2ad   : > { %1181 = vmax.xlane.f32.xlu1 %v1180_v12  ;;  %1175 = vmax.xlane.f32.xlu0 %v1174_v13  ;;  %v1171_v15 = vsel %vm1140_vm2, %v3263_v11, -inf }
 0x2b1   : > { %1178 = vmax.xlane.f32.xlu1 %v1177_v14  ;;  %1172 = vmax.xlane.f32.xlu0 %v1171_v15 }
 0x2b3   : > { %v3273_v16 = vpop.f32.mrb[10].mxu1 }
 0x2b4   : > { %v3275_v17 = vpop.f32.mrb[11].mxu1  ;;  %v1186_v18 = vsel %vm1140_vm2, %v3273_v16, -inf }
 0x2b5   : > { %1187 = vmax.xlane.f32.xlu0 %v1186_v18  ;;  %v1183_v19 = vsel %vm1140_vm2, %v3275_v17, -inf }
 0x2b9   : > { %1184 = vmax.xlane.f32.xlu0 %v1183_v19 }
 0x2c2   : > { %2659 = vrot.lane.b32.xlu1 %v3132_v53, %s2872_s9 }
 0x2cf   : > { %2654 = vrot.lane.b32.xlu0 %v3122_v48, %s2872_s9 }
 0x31a   : > { %v1146_v20 = vpop.xlane.xlu0 %1145 }
 0x31b   : > { %v1190_v21 = vsub.f32 %v2336_v49, %v1146_v20 }
 0x31d   : > { %v1207_v22 = vmul.f32 1.442695, %v1190_v21 }
 0x31e   : > { %v1143_v23 = vpop.xlane.xlu0 %1142 }
 0x31f   : > { %2673 = vpow2.f32 %v1207_v22  ;;  %v1189_v24 = vsub.f32 %v508_v50, %v1143_v23 }
 0x321   : > { %v1205_v25 = vmul.f32 1.442695, %v1189_v24 }
 0x322   : > { %v1152_v26 = vpop.xlane.xlu0 %1151 }
 0x323   : > { %2675 = vpow2.f32 %v1205_v25  ;;  %v1192_v27 = vsub.f32 %v2343_v54, %v1152_v26  ;;  %v1149_v28 = vpop.xlane.xlu1 %1148 }
 0x324   : > { %v1191_v29 = vsub.f32 %v597_v55, %v1149_v28 }
 0x325   : > { %v1211_v30 = vmul.f32 1.442695, %v1192_v27 }
 0x326   : > { %v1209_v31 = vmul.f32 1.442695, %v1191_v29 }
 0x327   : > { %2677 = vpow2.f32 %v1211_v30 }
 0x328   : > { %2679 = vpow2.f32 %v1209_v31 }
 0x329   : > { %v3285_v32 = vpop.eup %2673 }
 0x32a   : > { %v1158_v53 = vpop.xlane.xlu1 %1157  ;;  %v1240_v48 = vsel %vm1140_vm2, %v3285_v32, 0.0 }
 0x32b   : > { %v1194_v33 = vsub.f32 %v2350_v59, %v1158_v53  ;;  %1241 = vadd.xlane.f32.xlu1 %v1240_v48 }
 0x32d   : > { %v3289_v34 = vpop.eup %2675  ;;  %v1215_v35 = vmul.f32 1.442695, %v1194_v33 }
 0x32e   : > { %v1170_v36 = vpop.xlane.xlu1 %1169  ;;  %v1237_v37 = vsel %vm1140_vm2, %v3289_v34, 0.0 }
 0x32f   : > { %2681 = vpow2.f32 %v1215_v35  ;;  %v1198_v38 = vsub.f32 %v3236_v60, %v1170_v36  ;;  %1238 = vadd.xlane.f32.xlu1 %v1237_v37 }
 0x331   : > { %v3294_v40 = vpop.eup %2677  ;;  %v1223_v42 = vmul.f32 1.442695, %v1198_v38 }
 0x332   : > { %v1155_v43 = vpop.xlane.xlu1 %1154  ;;  %v1164_v39 = vpop.xlane.xlu0 %1163  ;;  %v1246_v44 = vsel %vm1140_vm2, %v3294_v40, 0.0 }
 0x333   : > { %v3298_v45 = vpop.eup %2679  ;;  %2683 = vpow2.f32 %v1223_v42  ;;  %v1193_v46 = vsub.f32 %v3238_v61, %v1155_v43  ;;  %v1196_v49 = vsub.f32 %v3245_v2, %v1164_v39  ;;  %1247 = vadd.xlane.f32.xlu0 %v1246_v44 }
 0x334   : > { %v1243_v55 = vsel %vm1140_vm2, %v3298_v45, 0.0 }
 0x335   : > { %v1213_v50 = vmul.f32 1.442695, %v1193_v46  ;;  %v1219_v51 = vmul.f32 1.442695, %v1196_v49 }
 0x336   : > { %v1167_v52 = vpop.xlane.xlu1 %1166  ;;  %v1161_v54 = vpop.xlane.xlu0 %1160 }
 0x337   : > { %2685 = vpow2.f32 %v1213_v50  ;;  %v1197_v56 = vsub.f32 %v3241_v0, %v1167_v52  ;;  %v1195_v57 = vsub.f32 %v3249_v4, %v1161_v54  ;;  %1244 = vadd.xlane.f32.xlu0 %v1243_v55 }
 0x338   : > { %2687 = vpow2.f32 %v1219_v51 }
 0x339   : > { %v3306_v59 = vpop.eup %2681  ;;  %v1221_v60 = vmul.f32 1.442695, %v1197_v56  ;;  %v1217_v61 = vmul.f32 1.442695, %v1195_v57 }
 0x33a   : > { %v1182_v63 = vpop.xlane.xlu1 %1181  ;;  %v1176_v1 = vpop.xlane.xlu0 %1175  ;;  %v1252_v2 = vsel %vm1140_vm2, %v3306_v59, 0.0 }
 0x33b   : > { %2689 = vpow2.f32 %v1221_v60  ;;  %v1202_v5 = vsub.f32 %v3247_v3, %v1182_v63  ;;  %v1200_v6 = vsub.f32 %v3261_v10, %v1176_v1  ;;  %1253 = vadd.xlane.f32.xlu1 %v1252_v2 }
 0x33c   : > { %2691 = vpow2.f32 %v1217_v61 }
 0x33d   : > { %v3312_v0 = vpop.eup %2683  ;;  %v1231_v4 = vmul.f32 1.442695, %v1202_v5  ;;  %v1227_v8 = vmul.f32 1.442695, %v1200_v6 }
 0x33e   : > { %v1179_v9 = vpop.xlane.xlu1 %1178  ;;  %v1173_v12 = vpop.xlane.xlu0 %1172  ;;  %v1264_v13 = vsel %vm1140_vm2, %v3312_v0, 0.0 }
 0x33f   : > { %2693 = vpow2.f32 %v1231_v4  ;;  %v1201_v14 = vsub.f32 %v3255_v7, %v1179_v9  ;;  %v1199_v15 = vsub.f32 %v3263_v11, %v1173_v12  ;;  %1265 = vadd.xlane.f32.xlu1 %v1264_v13 }
 0x340   : > { %2695 = vpow2.f32 %v1227_v8 }
 0x341   : > { %v3318_v3 = vpop.eup %2685  ;;  %v1229_v10 = vmul.f32 1.442695, %v1201_v14  ;;  %v1225_v18 = vmul.f32 1.442695, %v1199_v15 }
 0x342   : > { %v3320_v19 = vpop.eup %2687  ;;  %v1188_v20 = vpop.xlane.xlu0 %1187  ;;  %v1249_v21 = vsel %vm1140_vm2, %v3318_v3, 0.0 }
 0x343   : > { %2697 = vpow2.f32 %v1229_v10  ;;  %v1204_v22 = vsub.f32 %v3273_v16, %v1188_v20  ;;  %1250 = vadd.xlane.f32.xlu1 %v1249_v21  ;;  %v1258_v7 = vsel %vm1140_vm2, %v3320_v19, 0.0  ;;  %v2660_v43 = vpop.permute.xlu1 %2659 }
 0x344   : > { %2699 = vpow2.f32 %v1225_v18  ;;  %1259 = vadd.xlane.f32.xlu0 %v1258_v7  ;;  %v2662_v1 = vunpack.i.h.bf16 %v2660_v43  ;;  %v2661_v2 = vunpack.i.l.bf16 %v2660_v43 }
 0x345   : > { %v3327_v11 = vpop.eup %2689  ;;  %v1235_v23 = vmul.f32 1.442695, %v1204_v22 }
 0x346   : > { %v3329_v24 = vpop.eup %2691  ;;  %v1185_v25 = vpop.xlane.xlu0 %1184  ;;  %v1261_v26 = vsel %vm1140_vm2, %v3327_v11, 0.0  ;;  %v2518_v4 = vpack.c.bf16 %v2662_v1, %v2661_v2 }
 0x347   : > { %2701 = vpow2.f32 %v1235_v23  ;;  %v1203_v27 = vsub.f32 %v3275_v17, %v1185_v25  ;;  %1262 = vadd.xlane.f32.xlu1 %v1261_v26  ;;  %v1255_v16 = vsel %vm1140_vm2, %v3329_v24, 0.0 }
 0x348   : > { %1256 = vadd.xlane.f32.xlu0 %v1255_v16 }
 0x349   : > { %v3336_v28 = vpop.eup %2693  ;;  %v1233_v29 = vmul.f32 1.442695, %v1203_v27 }
 0x34a   : > { %v3338_v30 = vpop.eup %2695  ;;  %v1276_v31 = vsel %vm1140_vm2, %v3336_v28, 0.0  ;;  %v2655_v44 = vpop.permute.xlu0 %2654 }
 0x34b   : > { %2703 = vpow2.f32 %v1233_v29  ;;  %1277 = vadd.xlane.f32.xlu1 %v1276_v31  ;;  %v1270_v53 = vsel %vm1140_vm2, %v3338_v30, 0.0  ;;  %v2657_v54 = vunpack.i.h.bf16 %v2655_v44  ;;  %v2656_v55 = vunpack.i.l.bf16 %v2655_v44 }
 0x34c   : > { %1271 = vadd.xlane.f32.xlu0 %v1270_v53 }
 0x34d   : > { %v3344_v48 = vpop.eup %2697 }
 0x34e   : > { %v3346_v17 = vpop.eup %2699  ;;  %v1273_v33 = vsel %vm1140_vm2, %v3344_v48, 0.0 }
 0x34f   : > { %1274 = vadd.xlane.f32.xlu1 %v1273_v33  ;;  %v1267_v35 = vsel %vm1140_vm2, %v3346_v17, 0.0 }
 0x350   : > { %1268 = vadd.xlane.f32.xlu0 %v1267_v35 }
 0x351   : > { %v3352_v36 = vpop.eup %2701 }
 0x352   : > { %v1282_v37 = vsel %vm1140_vm2, %v3352_v36, 0.0 }
 0x354   : > { %1283 = vadd.xlane.f32.xlu0 %v1282_v37 }
 0x355   : > { %v3356_v38 = vpop.eup %2703 }
 0x356   : > { %v1279_v42 = vsel %vm1140_vm2, %v3356_v38, 0.0 }
 0x358   : > { %1280 = vadd.xlane.f32.xlu0 %v1279_v42 }
 0x360   : > { %2669 = vrot.lane.b32.xlu1 %v3152_v62, %s2872_s9 }
 0x36e   : > { %2664 = vrot.lane.b32.xlu0 %v3142_v58, %s2872_s9  ;;  %v2514_v58 = vpack.c.bf16 %v2657_v54, %v2656_v55 }
 0x3b8   : > { %v1242_v39 = vpop.xlane.xlu1 %1241 }
 0x3b9   : > { %2705 = vrcp.f32 %v1242_v39 }
 0x3bc   : > { %v1239_v46 = vpop.xlane.xlu1 %1238 }
 0x3bd   : > { %2707 = vrcp.f32 %v1239_v46 }
 0x3c0   : > { %v1248_v49 = vpop.xlane.xlu0 %1247 }
 0x3c1   : > { %2709 = vrcp.f32 %v1248_v49 }
 0x3c3   : > { %v2706_v51 = vpop.eup %2705 }
 0x3c4   : > { %v1245_v50 = vpop.xlane.xlu0 %1244  ;;  %v1302_v57 = vmul.f32 %v2706_v51, %v3285_v32 }
 0x3c5   : > { %2711 = vrcp.f32 %v1245_v50 }
 0x3c7   : > { %v2708_v52 = vpop.eup %2707 }
 0x3c8   : > { %v1254_v56 = vpop.xlane.xlu1 %1253  ;;  %v1301_v62 = vmul.f32 %v2708_v52, %v3289_v34 }
 0x3c9   : > { %2713 = vrcp.f32 %v1254_v56 }
 0x3ca   : > { %2390 = vmatprep.mubr.msk.f32.mxu0 %vm1140_vm2, %v1301_v62 }
 0x3cb   : > { %2391 = vmatmul.mubr.msk.f32.vlgmr.msra.gmra.mrb[20].mxu0 %vm1140_vm2, %v1302_v57  ;;  %v2710_v61 = vpop.eup %2709 }
 0x3cc   : > { %2509 = vmatpush3.bf16.msra.mxu0 %v3214_v41  ;;  %v1266_v60 = vpop.xlane.xlu1 %1265  ;;  %v1304_v34 = vmul.f32 %v2710_v61, %v3294_v40 }
 0x3cd   : > { %2515 = vmatprep.subr.bf16.mxu0 %v2514_v58 }
 0x3cf   : > { %v2712_v63 = vpop.eup %2711 }
 0x3d0   : > { %v1251_v5 = vpop.xlane.xlu1 %1250  ;;  %v1303_v6 = vmul.f32 %v2712_v63, %v3298_v45 }
 0x3d1   : > { %2715 = vrcp.f32 %v1251_v5  ;;  %v1260_v32 = vpop.xlane.xlu0 %1259 }
 0x3d2   : > { %2397 = vmatprep.mubr.msk.f32.mxu1 %vm1140_vm2, %v1303_v6  ;;  %2717 = vrcp.f32 %v1266_v60 }
 0x3d3   : > { %2398 = vmatmul.mubr.msk.f32.vlgmr.msra.gmra.mrb[12].mxu1 %vm1140_vm2, %v1304_v34  ;;  %v2714_v45 = vpop.eup %2713 }
 0x3d4   : > { %2513 = vmatpush3.bf16.msra.mxu1 %v3227_v47  ;;  %v1263_v41 = vpop.xlane.xlu1 %1262  ;;  %v1306_v15 = vmul.f32 %v2714_v45, %v3306_v59 }
 0x3d5   : > { %2719 = vrcp.f32 %v1263_v41  ;;  %2519 = vmatprep.subr.bf16.mxu1 %v2518_v4  ;;  %v1257_v8 = vpop.xlane.xlu0 %1256 }
 0x3d6   : > { %2721 = vrcp.f32 %v1260_v32 }
 0x3d7   : > { %2723 = vrcp.f32 %v1257_v8 }
 0x3d8   : > { %v1278_v9 = vpop.xlane.xlu1 %1277 }
 0x3d9   : > { %v1272_v12 = vpop.xlane.xlu0 %1271 }
 0x3db   : > { %v2716_v40 = vpop.eup %2715 }
 0x3dc   : > { %v1275_v13 = vpop.xlane.xlu1 %1274  ;;  %v1305_v14 = vmul.f32 %v2716_v40, %v3318_v3  ;;  %v2718_v10 = vpop.eup %2717 }
 0x3dd   : > { %2725 = vrcp.f32 %v1275_v13  ;;  %v1269_v18 = vpop.xlane.xlu0 %1268  ;;  %v1310_v3 = vmul.f32 %v2718_v10, %v3312_v0 }
 0x3de   : > { %2727 = vrcp.f32 %v1272_v12  ;;  %2404 = vmatprep.mubr.msk.f32.mxu0 %vm1140_vm2, %v1305_v14 }
 0x3df   : > { %v2720_v47 = vpop.eup %2719  ;;  %2729 = vrcp.f32 %v1269_v18  ;;  %2405 = vmatmul.mubr.msk.f32.vlgmr.msra.gmra.mrb[22].mxu0 %vm1140_vm2, %v1306_v15 }
 0x3e0   : > { %v2722_v20 = vpop.eup %2721  ;;  %2517 = vmatpush3.bf16.msra.mxu0 %v2514_v58  ;;  %v2670_v21 = vpop.permute.xlu1 %2669  ;;  %v1309_v22 = vmul.f32 %v2720_v47, %v3327_v11  ;;  %2731 = vrcp.f32 %v1278_v9 }
 0x3e1   : > { %v2724_v7 = vpop.eup %2723  ;;  %v2672_v23 = vunpack.i.h.bf16 %v2670_v21  ;;  %v2671_v59 = vunpack.i.l.bf16 %v2670_v21  ;;  %v1284_v25 = vpop.xlane.xlu0 %1283  ;;  %v1308_v27 = vmul.f32 %v2722_v20, %v3320_v19 }
 0x3e2   : > { %v1307_v26 = vmul.f32 %v2724_v7, %v3329_v24  ;;  %2418 = vmatprep.mubr.msk.f32.mxu0 %vm1140_vm2, %v1309_v22  ;;  %2733 = vrcp.f32 %v1284_v25 }
 0x3e3   : > { %v2526_v16 = vpack.c.bf16 %v2672_v23, %v2671_v59  ;;  %2419 = vmatmul.mubr.msk.f32.vlgmr.msra.gmra.mrb[24].mxu0 %vm1140_vm2, %v1310_v3 }
 0x3e4   : > { %2411 = vmatprep.mubr.msk.f32.mxu1 %vm1140_vm2, %v1307_v26 }
 0x3e5   : > { %2412 = vmatmul.mubr.msk.f32.vlgmr.msra.gmra.mrb[14].mxu1 %vm1140_vm2, %v1308_v27  ;;  %v1281_v0 = vpop.xlane.xlu0 %1280 }
 0x3e6   : > { %2521 = vmatpush3.bf16.msra.mxu1 %v2518_v4  ;;  %2735 = vrcp.f32 %v1281_v0 }
 0x3e7   : > { %v2726_v11 = vpop.eup %2725  ;;  %2527 = vmatprep.subr.bf16.mxu1 %v2526_v16 }
 0x3e8   : > { %v2728_v29 = vpop.eup %2727  ;;  %v1313_v24 = vmul.f32 %v2726_v11, %v3344_v48 }
 0x3e9   : > { %v2730_v31 = vpop.eup %2729  ;;  %v2665_v53 = vpop.permute.xlu0 %2664  ;;  %v1312_v33 = vmul.f32 %v2728_v29, %v3338_v30 }
 0x3ea   : > { %v1311_v19 = vmul.f32 %v2730_v31, %v3346_v17  ;;  %2432 = vmatprep.mubr.msk.f32.mxu0 %vm1140_vm2, %v1313_v24  ;;  %v2667_v35 = vunpack.i.h.bf16 %v2665_v53  ;;  %v2666_v37 = vunpack.i.l.bf16 %v2665_v53  ;;  %v2732_v43 = vpop.eup %2731 }
 0x3eb   : > { %v1314_v17 = vmul.f32 %v2732_v43, %v3336_v28 }
 0x3ec   : > { %2425 = vmatprep.mubr.msk.f32.mxu1 %vm1140_vm2, %v1311_v19  ;;  %v2522_v42 = vpack.c.bf16 %v2667_v35, %v2666_v37  ;;  %v2734_v48 = vpop.eup %2733 }
 0x3ed   : > { %2426 = vmatmul.mubr.msk.f32.vlgmr.msra.gmra.mrb[16].mxu1 %vm1140_vm2, %v1312_v33  ;;  %v1316_v30 = vmul.f32 %v2734_v48, %v3352_v36 }
 0x3ee   : > { %2529 = vmatpush3.bf16.msra.mxu1 %v2526_v16  ;;  %2523 = vmatprep.subr.bf16.mxu0 %v2522_v42 }
 0x3ef   : > { %2525 = vmatpush3.bf16.msra.mxu0 %v2522_v42 }
 0x3f0   : > { %v2736_v39 = vpop.eup %2735 }
 0x3f1   : > { %v1315_v44 = vmul.f32 %v2736_v39, %v3356_v38 }
 0x3f2   : > { %2433 = vmatmul.mubr.msk.f32.vlgmr.msra.gmra.mrb[26].mxu0 %vm1140_vm2, %v1314_v17 }
 0x3f3   : > { %2439 = vmatprep.mubr.msk.f32.mxu1 %vm1140_vm2, %v1315_v44 }
 0x3f4   : > { %2440 = vmatmul.mubr.msk.f32.vlgmr.msra.gmra.mrb[18].mxu1 %vm1140_vm2, %v1316_v30 }
 0x49e   : > { %v2392_v46 = vpop.f32.mrb[20].mxu0 }
 0x49f   : > { %2014 = vst.msk [vmem:[%s3400_s4 + $0x8] sm:$0xff] %vm234_vm0, %v2392_v46  ;;  %v1395_v28 = vpop.f32.mrb[21].mxu0 }
 0x4a0   : > { %2013 = vst.msk [vmem:[%s3400_s4] sm:$0xff] %vm234_vm0, %v1395_v28 }
 0x4a6   : > { %v2399_v36 = vpop.f32.mrb[12].mxu1 }
 0x4a7   : > { %2016 = vst.msk [vmem:[%s3400_s4 + $0x18] sm:$0xff] %vm234_vm0, %v2399_v36  ;;  %v1482_v38 = vpop.f32.mrb[13].mxu1 }
 0x4a8   : > { %2015 = vst.msk [vmem:[%s3400_s4 + $0x10] sm:$0xff] %vm234_vm0, %v1482_v38 }
 0x4b2   : > { %v2406_v49 = vpop.f32.mrb[22].mxu0 }
 0x4b3   : > { %2018 = vst.msk [vmem:[%s3400_s4 + $0x28] sm:$0xff] %vm234_vm0, %v2406_v49  ;;  %v1569_v50 = vpop.f32.mrb[23].mxu0 }
 0x4b4   : > { %2017 = vst.msk [vmem:[%s3400_s4 + $0x20] sm:$0xff] %vm234_vm0, %v1569_v50 }
 0x4b6   : > { %v2420_v51 = vpop.f32.mrb[24].mxu0 }
 0x4b7   : > { %2022 = vst.msk [vmem:[%s3400_s4 + $0x48] sm:$0xff] %vm234_vm0, %v2420_v51  ;;  %v1743_v52 = vpop.f32.mrb[25].mxu0 }
 0x4b8   : > { %v2413_v54 = vpop.f32.mrb[14].mxu1  ;;  %2021 = vst.msk [vmem:[%s3400_s4 + $0x40] sm:$0xff] %vm234_vm0, %v1743_v52 }
 0x4b9   : > { %2020 = vst.msk [vmem:[%s3400_s4 + $0x38] sm:$0xff] %vm234_vm0, %v2413_v54  ;;  %v1656_v55 = vpop.f32.mrb[15].mxu1 }
 0x4ba   : > { %2019 = vst.msk [vmem:[%s3400_s4 + $0x30] sm:$0xff] %vm234_vm0, %v1656_v55 }
 0x4c0   : > { %v2427_v56 = vpop.f32.mrb[16].mxu1 }
 0x4c1   : > { %2024 = vst.msk [vmem:[%s3400_s4 + $0x58] sm:$0xff] %vm234_vm0, %v2427_v56  ;;  %v1830_v62 = vpop.f32.mrb[17].mxu1 }
 0x4c2   : > { %2023 = vst.msk [vmem:[%s3400_s4 + $0x50] sm:$0xff] %vm234_vm0, %v1830_v62 }
 0x4c5   : > { %v2434_v57 = vpop.f32.mrb[26].mxu0 }
 0x4c6   : > { %2026 = vst.msk [vmem:[%s3400_s4 + $0x68] sm:$0xff] %vm234_vm0, %v2434_v57  ;;  %v1917_v58 = vpop.f32.mrb[27].mxu0 }
 0x4c7   : > { %2025 = vst.msk [vmem:[%s3400_s4 + $0x60] sm:$0xff] %vm234_vm0, %v1917_v58  ;;  %v2441_v60 = vpop.f32.mrb[18].mxu1 }
 0x4c8   : > { %2028 = vst.msk [vmem:[%s3400_s4 + $0x78] sm:$0xff] %vm234_vm0, %v2441_v60  ;;  %v2004_v61 = vpop.f32.mrb[19].mxu1 }
 0x4c9   : > { %2027 = vst.msk [vmem:[%s3400_s4 + $0x70] sm:$0xff] %vm234_vm0, %v2004_v61 }
 0x4ca   : > { %2808 = shalt.err (!%p2805_p7)
}
 0x4cb   : > { %s2809_s7 = scalar_lea.hbm %s3433_s28, 2048  ;;  %s2813_s18 = scalar_lea.hbm %s3488_s3, 4096 }
 0x4cc   : > { %p2810_p9 = scmp.ne.s32.totalorder %s3433_s28, %s2809_s7  ;;  %p2814_p5 = scmp.lt.u32.totalorder %s3433_s28, %s3488_s3 }
 0x4cd   : > { %p2815_p11 = scmp.lt.u32.totalorder %s2813_s18, %s2809_s7  ;;  %p2817_p4 = scmp.lt.u32.totalorder %s2809_s7, %s3433_s28 }
 0x4ce   : > { %p2811_p1 = pnand %p2810_p9, %p2990_p12 }
 0x4cf   : > { %p2816_p2 = por %p2815_p11, %p2814_p5 }
 0x4d0   : > { %p2812_p0 = pneg %p2811_p1 }
 0x4d1   : > { %p2818_p6 = por %p2817_p4, %p2816_p2 }
 0x4d3   : > { %p2819_p8 = pnand %p2818_p6, %p2812_p0 }
 0x4d5   : > { %2822 = shalt.err (!%p2819_p8)
}
 0x4d6   : > { %s2874_s9 = smov 128   ;;  %s2875_s4 = smov 8  }
 0x4d7   : > { %2536 = dma.vmem_to_hbm [thread:$0]  (%p2990_p12), %s3435_s5, 2048, %s3433_s28, %s2030_s16, %s2874_s9, %s2874_s9, %s2875_s4  }
 0x4d8 PF: > { %s2059_s25 = sand.u32 1, %s2853_s12   ;;  %p3505_p10 = scmp.ne.s32.totalorder %s3493_s19, 0 }
 0x4d9   : > { %p3506_p13 = scmp.ge.s32.totalorder %s2865_s15, 2  ;;  %s2060_s11 = scalar_lea.sflag [#allocation4], %s2059_s25 }
 0x4db   : > { %p2547_p3 = pnand %p3506_p13, %p3505_p10 }
 0x4dd   : > { %2848 = dma.done.wait (!%p2547_p3), %s2060_s11, 2048  }
 0x4de   : > { %2850 = vsyncadd (!%p2547_p3), %s2060_s11, 4294965248  ;;  %p17_p7 = scmp.ge.s32.totalorder %s2952_s24, 4   ;;  %s3507_s12 = smov %s2857_s13 }
 0x4df   : > { %s3508_s13 = smov %s2861_s14  ;;  %s3509_s14 = smov %s2986_s17 }
 0x4e0   : > { %s3510_s15 = smov %s2952_s24  ;;  %19 = sbr.rel (!%p17_p7) target bundleno = 6 (0x6), region = 81 }
 0x4e7   :  { %2065 = vsyncpa [#allocation3], 1 }
 0x4e8   :  { %2067 = vsyncpa [#allocation3 + $0x1], 1 }
 0x4e9   :  { %2068 = vsyncpa [#allocation6], 1 }
 0x4ea   :  { %2069 = vsyncpa [#allocation4], 1 }
 0x4eb   :  { %2071 = vsyncpa [#allocation4 + $0x1], 1 }

</bundles_post_ra>
